<compile_context>
chip_gen: v7x
topology: tpu7x:2x2x1
jax: 0.10.0
libtpu: 0.0.40
codegen_flags: <defaults>
</compile_context>

<pallas_src>
import math
import functools

import numpy as np
import jax
import jax.numpy as jnp
from jax.experimental import pallas as pl
from jax.experimental.pallas import tpu as pltpu


# ----------------------------- in-kernel helpers -----------------------------

def _proj(x, w, b):
    """(B, L, Din) @ (Din, Dout) + (1, Dout) -> (B, L, Dout); f32 MXU accumulation."""
    B, L, Din = x.shape
    y = jnp.dot(x.reshape(B * L, Din), w, preferred_element_type=jnp.float32) + b
    return y.reshape(B, L, w.shape[1])


def _layer_norm(x, g, b, eps=1e-5):
    """LayerNorm over the last axis. x: (B, L, D); g, b: (1, D). eps matches nn.LayerNorm."""
    mu = jnp.mean(x, axis=-1, keepdims=True)
    var = jnp.mean(jnp.square(x - mu), axis=-1, keepdims=True)
    return (x - mu) * jax.lax.rsqrt(var + eps) * g[None] + b[None]


def _mha(q, kv, wqkv, bqkv, wo, bo, num_heads, mask=None, fuse_qkv=False):
    """Fully fused multi-head attention (everything VMEM/vreg resident).

    q: (B, Lq, D); kv: (B, Lk, D); wqkv: (D, 3D); bqkv: (1, 3D); wo: (D, D); bo: (1, D);
    mask: broadcastable to (B, Lq, Lk) or None.
    """
    B, Lq, D = q.shape
    hd = D // num_heads
    if fuse_qkv:                                   # q is kv: one matmul for Q|K|V
        qkv = _proj(q, wqkv, bqkv)
        qh, kh, vh = qkv[..., :D], qkv[..., D:2 * D], qkv[..., 2 * D:]
    else:                                          # separate Q, fused K|V matmul
        qh = _proj(q, wqkv[:, :D], bqkv[:, :D])
        kvh = _proj(kv, wqkv[:, D:], bqkv[:, D:])
        kh, vh = kvh[..., :D], kvh[..., D:]
    scale = 1.0 / math.sqrt(hd)
    heads = []
    for h in range(num_heads):                     # static unroll; heads stay in-kernel
        sl = slice(h * hd, (h + 1) * hd)
        s = jnp.einsum('bqd,bkd->bqk', qh[..., sl], kh[..., sl],
                       preferred_element_type=jnp.float32) * scale
        if mask is not None:
            s = jnp.where(mask, s, -1e30)
        s = s - jnp.max(s, axis=-1, keepdims=True)
        p = jnp.exp(s)
        p = p / jnp.sum(p, axis=-1, keepdims=True)
        heads.append(jnp.einsum('bqk,bkd->bqd', p, vh[..., sl],
                                preferred_element_type=jnp.float32))
    ctx = jnp.concatenate(heads, axis=-1)
    return _proj(ctx, wo, bo)


def _const_spec(shape):
    """Whole-array block with a constant index map (fetched once per pallas_call)."""
    n = len(shape)
    return pl.BlockSpec(tuple(shape), lambda i, n=n: (0,) * n)


# --------------------------- fused self-MHA kernel ----------------------------

def _self_mha_kernel(x_ref, wqkv_ref, bqkv_ref, wo_ref, bo_ref, o_ref, *, num_heads):
    x = x_ref[...]
    o_ref[...] = _mha(x, x, wqkv_ref[...], bqkv_ref[...], wo_ref[...], bo_ref[...],
                      num_heads, fuse_qkv=True).astype(o_ref.dtype)


def fused_self_mha(x, p, num_heads):
    """k = MHA(x, x, x) as a single fused pallas_call."""
    B, T, D = x.shape
    ins = [x, p['wqkv'], p['bqkv'], p['wo'], p['bo']]
    return pl.pallas_call(
        functools.partial(_self_mha_kernel, num_heads=num_heads),
        out_shape=jax.ShapeDtypeStruct((B, T, D), x.dtype),
        grid=(1,),
        in_specs=[_const_spec(a.shape) for a in ins],
        out_specs=_const_spec((B, T, D)),
    )(*ins)


# ----------------------- fused autoregressive step kernel ---------------------

def _posterior_step_kernel(hc_ref, kseq_ref, eps_ref, pe_ref, w0_ref,
                           mha_wqkv_ref, mha_bqkv_ref, mha_wo_ref, mha_bo_ref,
                           ln_ref, fc1w_ref, fc1b_ref, fc2w_ref, fc2b_ref,
                           *rest, num_heads, d_latent, has_prior):
    if has_prior:
        priorw_ref, w_out_ref, zml_ref, w_buf = rest
    else:
        w_out_ref, zml_ref, w_buf = rest

    i = pl.program_id(0)
    B, _, D = hc_ref.shape
    T_total = w_out_ref.shape[1]

    @pl.when(i == 0)
    def _init():
        # Zero the key buffer (masked positions must not hold NaN garbage) and
        # place w0 (repeated over batch) in slot 0.
        w_buf[...] = jnp.zeros_like(w_buf)
        w_buf[:, 0:1, :] = jnp.broadcast_to(w0_ref[...], (B, 1, D))

    def ln(idx):
        p = ln_ref[idx]                                  # (2, D): [gamma, beta]
        return p[0:1, :], p[1:2, :]

    def mha_p(idx):
        return (mha_wqkv_ref[idx], mha_bqkv_ref[idx], mha_wo_ref[idx], mha_bo_ref[idx])

    w_i = w_buf[:, pl.ds(i, 1), :]                       # (B, 1, D) query = w[:, i]
    w_keys = w_buf[:, 0:T_total, :]                      # (B, T, D) full prefix buffer
    key_pos = jax.lax.broadcasted_iota(jnp.int32, (1, 1, T_total), 2)
    causal_mask = key_pos <= i                           # only keys 0..i are valid

    if has_prior:
        g3, b3 = ln(2)
        a3 = _mha(w_i, priorw_ref[...], *mha_p(2), num_heads)
        q1 = _layer_norm(w_i + a3, g3, b3)               # w_tilde
    else:
        q1 = w_i

    g1, b1 = ln(0)
    a1 = _mha(q1, w_keys, *mha_p(0), num_heads, mask=causal_mask)
    w_bar = _layer_norm(q1 + a1, g1, b1)

    g2, b2 = ln(1)
    a2 = _mha(w_bar, hc_ref[...], *mha_p(1), num_heads)
    w_hat = _layer_norm(w_bar + a2, g2, b2)              # (B, 1, D)

    # fc1(cat([w_hat, k_i], dim=-1)) as two fused matmuls (no lane concat needed).
    fc1w = fc1w_ref[...]
    w_hat2 = w_hat.reshape(B, D)
    k_i = kseq_ref[:, pl.ds(i, 1), :].reshape(B, D)
    ml = (jnp.dot(w_hat2, fc1w[0:D, :], preferred_element_type=jnp.float32)
          + jnp.dot(k_i, fc1w[D:, :], preferred_element_type=jnp.float32)
          + fc1b_ref[...])                               # (B, 2*d_latent)
    mean = ml[:, :d_latent]
    logvar = ml[:, d_latent:]
    eps_i = eps_ref[:, pl.ds(i, 1), :].reshape(B, d_latent)
    z = mean + jnp.exp(logvar * 0.5) * eps_i             # (B, d_latent)

    fz = (jnp.dot(z, fc2w_ref[...], preferred_element_type=jnp.float32)
          + fc2b_ref[...])                               # (B, D)
    # TODO(synk): layers.AddPosition internals not provided; assumed LayerNorm(x + pe[t+1]).
    pe_i = pe_ref[pl.ds(i, 1), :]                        # (1, D) == pe[i + 1]
    g4, b4 = ln(3)
    w_new = _layer_norm((w_hat2 + fz + pe_i)[:, None, :], g4, b4)   # (B, 1, D)

    # Append to the autoregressive key buffer and emit this step's outputs.
    w_buf[:, pl.ds(i + 1, 1), :] = w_new
    w_out_ref[:, pl.ds(i, 1), :] = w_new.astype(w_out_ref.dtype)
    zml = jnp.concatenate([mean, logvar, z], axis=-1)    # (B, 3*d_latent)
    zml_ref[:, pl.ds(i, 1), :] = zml[:, None, :].astype(zml_ref.dtype)


def posterior_module_forward(prior_p, post_p, cfg, h_C, h_T, key, prior_W=None):
    """Pallas port of PosteriorModule.forward(h_C, h_T, prior_W)."""
    B, _, D = h_C.shape
    T_total = cfg['timesteps'] + cfg['future']
    dl = cfg['d_latent']
    M = cfg['M']

    # k = self.mha(h_T, h_T, h_T): one fused kernel, computed once per forward.
    k_seq = fused_self_mha(h_T, post_p['mha'], M)

    # Reparameterization noise (torch.randn equivalent), precomputed per step.
    eps = jax.random.normal(key, (B, T_total, dl), dtype=h_T.dtype)

    inputs = [h_C, k_seq, eps, prior_p['pe_step'], prior_p['w0'],
              prior_p['mha_wqkv'], prior_p['mha_bqkv'],
              prior_p['mha_wo'], prior_p['mha_bo'], prior_p['ln'],
              post_p['fc1_w'], post_p['fc1_b'], post_p['fc2_w'], post_p['fc2_b']]
    has_prior = prior_W is not None
    if has_prior:
        inputs.append(prior_W)

    kern = functools.partial(_posterior_step_kernel, num_heads=M,
                             d_latent=dl, has_prior=has_prior)
    w_out, zml = pl.pallas_call(
        kern,
        out_shape=(jax.ShapeDtypeStruct((B, T_total, D), h_C.dtype),
                   jax.ShapeDtypeStruct((B, T_total, 3 * dl), h_C.dtype)),
        grid=(T_total,),
        in_specs=[_const_spec(a.shape) for a in inputs],
        out_specs=(_const_spec((B, T_total, D)),
                   _const_spec((B, T_total, 3 * dl))),
        scratch_shapes=[pltpu.VMEM((B, T_total + 1, D), jnp.float32)],
        compiler_params=pltpu.CompilerParams(
            dimension_semantics=("arbitrary",)),  # steps are sequentially dependent
    )(*inputs)

    mean = zml[..., :dl]
    logvar = zml[..., dl:2 * dl]
    z = zml[..., 2 * dl:]
    w_list = [w_out[:, t:t + 1, :] for t in range(T_total)]
    z_list = [z[:, t, :] for t in range(T_total)]
    mean_list = [mean[:, t, :] for t in range(T_total)]
    logvar_list = [logvar[:, t, :] for t in range(T_total)]
    return w_list, z_list, mean_list, logvar_list


# --------------------------------- parameters ---------------------------------

def sinusoidal_pe(num_pos, d_model):
    pos = np.arange(num_pos)[:, None].astype(np.float64)
    i = np.arange(d_model)[None, :]
    angle = pos / np.power(10000.0, (2 * (i // 2)) / d_model)
    pe = np.zeros((num_pos, d_model))
    pe[:, 0::2] = np.sin(angle[:, 0::2])
    pe[:, 1::2] = np.cos(angle[:, 1::2])
    return jnp.asarray(pe, dtype=jnp.float32)


def init_params(key, cfg):
    D, dl = cfg['d_model'], cfg['d_latent']
    T_total = cfg['timesteps'] + cfg['future']
    keys = iter(jax.random.split(key, 64))

    def w(shape, scale=0.1):
        return (jax.random.normal(next(keys), shape) * scale).astype(jnp.float32)

    def mha_pack():
        return dict(wqkv=w((D, 3 * D)), bqkv=w((1, 3 * D), 0.01),
                    wo=w((D, D)), bo=w((1, D), 0.01))

    prior_mhas = [mha_pack() for _ in range(3)]          # mha1, mha2, mha3
    ln_stack = jnp.stack([jnp.stack([jnp.ones((D,), jnp.float32),
                                     jnp.zeros((D,), jnp.float32)])
                          for _ in range(4)])            # (4, 2, D): ln1, ln2, ln3, ap_ln
    pe = sinusoidal_pe(T_total + 1, D)
    return {
        'prior': {
            'w0': w((1, 1, D)),
            'mha_wqkv': jnp.stack([m['wqkv'] for m in prior_mhas]),
            'mha_bqkv': jnp.stack([m['bqkv'] for m in prior_mhas]),
            'mha_wo': jnp.stack([m['wo'] for m in prior_mhas]),
            'mha_bo': jnp.stack([m['bo'] for m in prior_mhas]),
            'ln': ln_stack,
            'pe_step': pe[1:T_total + 1],                # row t == pe[t+1] (hoisted once)
        },
        'posterior': {
            'mha': mha_pack(),
            'fc1_w': w((2 * D, 2 * dl)), 'fc1_b': w((1, 2 * dl), 0.01),
            'fc2_w': w((dl, D)), 'fc2_b': w((1, D), 0.01),
        },
    }


# ----------------------------------- main --------------------------------------

if __name__ == "__main__":
    cfg = dict(p=4, d_model=32, d_latent=8, M=4, timesteps=4, future=2)
    B = 2
    T_total = cfg['timesteps'] + cfg['future']

    key = jax.random.PRNGKey(0)
    key, kp, kc, kt, k1, k2 = jax.random.split(key, 6)
    params = init_params(kp, cfg)

    # PosteriorModule consumes already-embedded h_C / h_T.
    h_C = jax.random.normal(kc, (B, cfg['timesteps'], cfg['d_model']), jnp.float32)
    h_T = jax.random.normal(kt, (B, T_total, cfg['d_model']), jnp.float32)

    # Layer 0: prior_W is None.
    w_l, z_l, m_l, lv_l = posterior_module_forward(
        params['prior'], params['posterior'], cfg, h_C, h_T, k1, None)
    # Layer 1: prior_W = previous layer's W (as in multi-layer ProTran).
    prior_W = jnp.concatenate(w_l, axis=1)
    w_l2, z_l2, m_l2, lv_l2 = posterior_module_forward(
        params['prior'], params['posterior'], cfg, h_C, h_T, k2, prior_W)

    jax.block_until_ready((w_l, z_l, m_l, lv_l, w_l2, z_l2, m_l2, lv_l2))

    assert len(w_l) == T_total and w_l[0].shape == (B, 1, cfg['d_model'])
    assert len(z_l) == T_total and z_l[0].shape == (B, cfg['d_latent'])
    assert m_l[-1].shape == (B, cfg['d_latent'])
    assert lv_l[0].shape == (B, cfg['d_latent'])
    assert w_l2[-1].shape == (B, 1, cfg['d_model'])
    assert z_l2[-1].shape == (B, cfg['d_latent'])
    assert bool(jnp.all(jnp.isfinite(jnp.concatenate(w_l2, axis=1))))
    assert bool(jnp.all(jnp.isfinite(jnp.stack(z_l2))))
    print("KERNEL_OK")
</pallas_src>

<mosaic_0001>
module attributes {stable_mosaic.version = 11 : i64} {
  func.func @_self_mha_kernel(%arg0: i32, %arg1: memref<2x6x32xf32, #tpu.memory_space<vmem>>, %arg2: memref<32x96xf32, #tpu.memory_space<vmem>>, %arg3: memref<1x96xf32, #tpu.memory_space<vmem>>, %arg4: memref<32x32xf32, #tpu.memory_space<vmem>>, %arg5: memref<1x32xf32, #tpu.memory_space<vmem>>, %arg6: memref<2x6x32xf32, #tpu.memory_space<vmem>>) attributes {dimension_semantics = [#tpu.dimension_semantics<arbitrary>], iteration_bounds = array<i64: 1>, scalar_prefetch = 0 : i64, scratch_operands = 0 : i64, tpu.core_type = #tpu.core_type<tc>, window_params = [{pipeline_mode = #tpu.pipeline_mode<synchronous>, transform_indices = @transform_0, window_bounds = array<i64: 2, 6, 32>}, {pipeline_mode = #tpu.pipeline_mode<synchronous>, transform_indices = @transform_1, window_bounds = array<i64: 32, 96>}, {pipeline_mode = #tpu.pipeline_mode<synchronous>, transform_indices = @transform_2, window_bounds = array<i64: 1, 96>}, {pipeline_mode = #tpu.pipeline_mode<synchronous>, transform_indices = @transform_3, window_bounds = array<i64: 32, 32>}, {pipeline_mode = #tpu.pipeline_mode<synchronous>, transform_indices = @transform_4, window_bounds = array<i64: 1, 32>}, {pipeline_mode = #tpu.pipeline_mode<synchronous>, transform_indices = @transform_5, window_bounds = array<i64: 2, 6, 32>}]} {
    %c0 = arith.constant 0 : index
    %c0_0 = arith.constant 0 : index
    %c0_1 = arith.constant 0 : index
    %0 = vector.load %arg1[%c0, %c0_0, %c0_1] : memref<2x6x32xf32, #tpu.memory_space<vmem>>, vector<2x6x32xf32>
    %c0_2 = arith.constant 0 : index
    %c0_3 = arith.constant 0 : index
    %1 = vector.load %arg2[%c0_2, %c0_3] : memref<32x96xf32, #tpu.memory_space<vmem>>, vector<32x96xf32>
    %c0_4 = arith.constant 0 : index
    %c0_5 = arith.constant 0 : index
    %2 = vector.load %arg3[%c0_4, %c0_5] : memref<1x96xf32, #tpu.memory_space<vmem>>, vector<1x96xf32>
    %c0_6 = arith.constant 0 : index
    %c0_7 = arith.constant 0 : index
    %3 = vector.load %arg4[%c0_6, %c0_7] : memref<32x32xf32, #tpu.memory_space<vmem>>, vector<32x32xf32>
    %c0_8 = arith.constant 0 : index
    %c0_9 = arith.constant 0 : index
    %4 = vector.load %arg5[%c0_8, %c0_9] : memref<1x32xf32, #tpu.memory_space<vmem>>, vector<1x32xf32>
    %5 = vector.shape_cast %0 : vector<2x6x32xf32> to vector<12x32xf32>
    %cst = arith.constant dense<0.000000e+00> : vector<12x96xf32>
    %6 = tpu.matmul %5, %1, %cst {dimension_numbers = #tpu.dot_dimension_numbers<[1], [0], [0], [1], [0, 0, 1, 1], [], []>} : vector<12x32xf32>, vector<32x96xf32>, vector<12x96xf32> -> vector<12x96xf32>
    %7 = vector.broadcast %2 : vector<1x96xf32> to vector<12x96xf32>
    %8 = arith.addf %6, %7 : vector<12x96xf32>
    %9 = vector.shape_cast %8 : vector<12x96xf32> to vector<2x6x96xf32>
    %10 = vector.extract_strided_slice %9 {offsets = [0, 0, 0], sizes = [2, 6, 32], strides = [1, 1, 1]} : vector<2x6x96xf32> to vector<2x6x32xf32>
    %11 = vector.extract_strided_slice %9 {offsets = [0, 0, 32], sizes = [2, 6, 32], strides = [1, 1, 1]} : vector<2x6x96xf32> to vector<2x6x32xf32>
    %12 = vector.extract_strided_slice %9 {offsets = [0, 0, 64], sizes = [2, 6, 32], strides = [1, 1, 1]} : vector<2x6x96xf32> to vector<2x6x32xf32>
    %13 = vector.extract_strided_slice %10 {offsets = [0, 0, 0], sizes = [2, 6, 8], strides = [1, 1, 1]} : vector<2x6x32xf32> to vector<2x6x8xf32>
    %14 = vector.extract_strided_slice %11 {offsets = [0, 0, 0], sizes = [2, 6, 8], strides = [1, 1, 1]} : vector<2x6x32xf32> to vector<2x6x8xf32>
    "tpu.trace_start"() <{level = 10 : i32, message = "bqd,bkd->bqk"}> : () -> ()
    %cst_10 = arith.constant dense<0.000000e+00> : vector<2x6x6xf32>
    %15 = tpu.matmul %13, %14, %cst_10 {dimension_numbers = #tpu.dot_dimension_numbers<[2], [2], [1], [1], [0, 0, 0, 1, 1, 1], [0], [0]>} : vector<2x6x8xf32>, vector<2x6x8xf32>, vector<2x6x6xf32> -> vector<2x6x6xf32>
    "tpu.trace_stop"() : () -> ()
    %cst_11 = arith.constant 0.353553385 : f32
    %16 = vector.broadcast %cst_11 : f32 to vector<2x6x6xf32>
    %17 = arith.mulf %15, %16 : vector<2x6x6xf32>
    %cst_12 = arith.constant dense<0xFF800000> : vector<2x6xf32>
    %18 = vector.multi_reduction <maximumf>, %17, %cst_12 [2] : vector<2x6x6xf32> to vector<2x6xf32>
    %19 = vector.shape_cast %18 : vector<2x6xf32> to vector<2x6x1xf32>
    %20 = vector.broadcast %19 : vector<2x6x1xf32> to vector<2x6x6xf32>
    %21 = arith.subf %17, %20 : vector<2x6x6xf32>
    %22 = math.exp %21 : vector<2x6x6xf32>
    %cst_13 = arith.constant dense<0.000000e+00> : vector<2x6xf32>
    %23 = vector.multi_reduction <add>, %22, %cst_13 [2] : vector<2x6x6xf32> to vector<2x6xf32>
    %24 = vector.shape_cast %23 : vector<2x6xf32> to vector<2x6x1xf32>
    %25 = vector.broadcast %24 : vector<2x6x1xf32> to vector<2x6x6xf32>
    %26 = arith.divf %22, %25 : vector<2x6x6xf32>
    %27 = vector.extract_strided_slice %12 {offsets = [0, 0, 0], sizes = [2, 6, 8], strides = [1, 1, 1]} : vector<2x6x32xf32> to vector<2x6x8xf32>
    "tpu.trace_start"() <{level = 10 : i32, message = "bqk,bkd->bqd"}> : () -> ()
    %cst_14 = arith.constant dense<0.000000e+00> : vector<2x6x8xf32>
    %28 = tpu.matmul %26, %27, %cst_14 {dimension_numbers = #tpu.dot_dimension_numbers<[2], [1], [1], [2], [0, 0, 0, 1, 1, 2], [0], [0]>} : vector<2x6x6xf32>, vector<2x6x8xf32>, vector<2x6x8xf32> -> vector<2x6x8xf32>
    "tpu.trace_stop"() : () -> ()
    %29 = vector.extract_strided_slice %10 {offsets = [0, 0, 8], sizes = [2, 6, 8], strides = [1, 1, 1]} : vector<2x6x32xf32> to vector<2x6x8xf32>
    %30 = vector.extract_strided_slice %11 {offsets = [0, 0, 8], sizes = [2, 6, 8], strides = [1, 1, 1]} : vector<2x6x32xf32> to vector<2x6x8xf32>
    "tpu.trace_start"() <{level = 10 : i32, message = "bqd,bkd->bqk"}> : () -> ()
    %cst_15 = arith.constant dense<0.000000e+00> : vector<2x6x6xf32>
    %31 = tpu.matmul %29, %30, %cst_15 {dimension_numbers = #tpu.dot_dimension_numbers<[2], [2], [1], [1], [0, 0, 0, 1, 1, 1], [0], [0]>} : vector<2x6x8xf32>, vector<2x6x8xf32>, vector<2x6x6xf32> -> vector<2x6x6xf32>
    "tpu.trace_stop"() : () -> ()
    %cst_16 = arith.constant 0.353553385 : f32
    %32 = vector.broadcast %cst_16 : f32 to vector<2x6x6xf32>
    %33 = arith.mulf %31, %32 : vector<2x6x6xf32>
    %cst_17 = arith.constant dense<0xFF800000> : vector<2x6xf32>
    %34 = vector.multi_reduction <maximumf>, %33, %cst_17 [2] : vector<2x6x6xf32> to vector<2x6xf32>
    %35 = vector.shape_cast %34 : vector<2x6xf32> to vector<2x6x1xf32>
    %36 = vector.broadcast %35 : vector<2x6x1xf32> to vector<2x6x6xf32>
    %37 = arith.subf %33, %36 : vector<2x6x6xf32>
    %38 = math.exp %37 : vector<2x6x6xf32>
    %cst_18 = arith.constant dense<0.000000e+00> : vector<2x6xf32>
    %39 = vector.multi_reduction <add>, %38, %cst_18 [2] : vector<2x6x6xf32> to vector<2x6xf32>
    %40 = vector.shape_cast %39 : vector<2x6xf32> to vector<2x6x1xf32>
    %41 = vector.broadcast %40 : vector<2x6x1xf32> to vector<2x6x6xf32>
    %42 = arith.divf %38, %41 : vector<2x6x6xf32>
    %43 = vector.extract_strided_slice %12 {offsets = [0, 0, 8], sizes = [2, 6, 8], strides = [1, 1, 1]} : vector<2x6x32xf32> to vector<2x6x8xf32>
    "tpu.trace_start"() <{level = 10 : i32, message = "bqk,bkd->bqd"}> : () -> ()
    %cst_19 = arith.constant dense<0.000000e+00> : vector<2x6x8xf32>
    %44 = tpu.matmul %42, %43, %cst_19 {dimension_numbers = #tpu.dot_dimension_numbers<[2], [1], [1], [2], [0, 0, 0, 1, 1, 2], [0], [0]>} : vector<2x6x6xf32>, vector<2x6x8xf32>, vector<2x6x8xf32> -> vector<2x6x8xf32>
    "tpu.trace_stop"() : () -> ()
    %45 = vector.extract_strided_slice %10 {offsets = [0, 0, 16], sizes = [2, 6, 8], strides = [1, 1, 1]} : vector<2x6x32xf32> to vector<2x6x8xf32>
    %46 = vector.extract_strided_slice %11 {offsets = [0, 0, 16], sizes = [2, 6, 8], strides = [1, 1, 1]} : vector<2x6x32xf32> to vector<2x6x8xf32>
    "tpu.trace_start"() <{level = 10 : i32, message = "bqd,bkd->bqk"}> : () -> ()
    %cst_20 = arith.constant dense<0.000000e+00> : vector<2x6x6xf32>
    %47 = tpu.matmul %45, %46, %cst_20 {dimension_numbers = #tpu.dot_dimension_numbers<[2], [2], [1], [1], [0, 0, 0, 1, 1, 1], [0], [0]>} : vector<2x6x8xf32>, vector<2x6x8xf32>, vector<2x6x6xf32> -> vector<2x6x6xf32>
    "tpu.trace_stop"() : () -> ()
    %cst_21 = arith.constant 0.353553385 : f32
    %48 = vector.broadcast %cst_21 : f32 to vector<2x6x6xf32>
    %49 = arith.mulf %47, %48 : vector<2x6x6xf32>
    %cst_22 = arith.constant dense<0xFF800000> : vector<2x6xf32>
    %50 = vector.multi_reduction <maximumf>, %49, %cst_22 [2] : vector<2x6x6xf32> to vector<2x6xf32>
    %51 = vector.shape_cast %50 : vector<2x6xf32> to vector<2x6x1xf32>
    %52 = vector.broadcast %51 : vector<2x6x1xf32> to vector<2x6x6xf32>
    %53 = arith.subf %49, %52 : vector<2x6x6xf32>
    %54 = math.exp %53 : vector<2x6x6xf32>
    %cst_23 = arith.constant dense<0.000000e+00> : vector<2x6xf32>
    %55 = vector.multi_reduction <add>, %54, %cst_23 [2] : vector<2x6x6xf32> to vector<2x6xf32>
    %56 = vector.shape_cast %55 : vector<2x6xf32> to vector<2x6x1xf32>
    %57 = vector.broadcast %56 : vector<2x6x1xf32> to vector<2x6x6xf32>
    %58 = arith.divf %54, %57 : vector<2x6x6xf32>
    %59 = vector.extract_strided_slice %12 {offsets = [0, 0, 16], sizes = [2, 6, 8], strides = [1, 1, 1]} : vector<2x6x32xf32> to vector<2x6x8xf32>
    "tpu.trace_start"() <{level = 10 : i32, message = "bqk,bkd->bqd"}> : () -> ()
    %cst_24 = arith.constant dense<0.000000e+00> : vector<2x6x8xf32>
    %60 = tpu.matmul %58, %59, %cst_24 {dimension_numbers = #tpu.dot_dimension_numbers<[2], [1], [1], [2], [0, 0, 0, 1, 1, 2], [0], [0]>} : vector<2x6x6xf32>, vector<2x6x8xf32>, vector<2x6x8xf32> -> vector<2x6x8xf32>
    "tpu.trace_stop"() : () -> ()
    %61 = vector.extract_strided_slice %10 {offsets = [0, 0, 24], sizes = [2, 6, 8], strides = [1, 1, 1]} : vector<2x6x32xf32> to vector<2x6x8xf32>
    %62 = vector.extract_strided_slice %11 {offsets = [0, 0, 24], sizes = [2, 6, 8], strides = [1, 1, 1]} : vector<2x6x32xf32> to vector<2x6x8xf32>
    "tpu.trace_start"() <{level = 10 : i32, message = "bqd,bkd->bqk"}> : () -> ()
    %cst_25 = arith.constant dense<0.000000e+00> : vector<2x6x6xf32>
    %63 = tpu.matmul %61, %62, %cst_25 {dimension_numbers = #tpu.dot_dimension_numbers<[2], [2], [1], [1], [0, 0, 0, 1, 1, 1], [0], [0]>} : vector<2x6x8xf32>, vector<2x6x8xf32>, vector<2x6x6xf32> -> vector<2x6x6xf32>
    "tpu.trace_stop"() : () -> ()
    %cst_26 = arith.constant 0.353553385 : f32
    %64 = vector.broadcast %cst_26 : f32 to vector<2x6x6xf32>
    %65 = arith.mulf %63, %64 : vector<2x6x6xf32>
    %cst_27 = arith.constant dense<0xFF800000> : vector<2x6xf32>
    %66 = vector.multi_reduction <maximumf>, %65, %cst_27 [2] : vector<2x6x6xf32> to vector<2x6xf32>
    %67 = vector.shape_cast %66 : vector<2x6xf32> to vector<2x6x1xf32>
    %68 = vector.broadcast %67 : vector<2x6x1xf32> to vector<2x6x6xf32>
    %69 = arith.subf %65, %68 : vector<2x6x6xf32>
    %70 = math.exp %69 : vector<2x6x6xf32>
    %cst_28 = arith.constant dense<0.000000e+00> : vector<2x6xf32>
    %71 = vector.multi_reduction <add>, %70, %cst_28 [2] : vector<2x6x6xf32> to vector<2x6xf32>
    %72 = vector.shape_cast %71 : vector<2x6xf32> to vector<2x6x1xf32>
    %73 = vector.broadcast %72 : vector<2x6x1xf32> to vector<2x6x6xf32>
    %74 = arith.divf %70, %73 : vector<2x6x6xf32>
    %75 = vector.extract_strided_slice %12 {offsets = [0, 0, 24], sizes = [2, 6, 8], strides = [1, 1, 1]} : vector<2x6x32xf32> to vector<2x6x8xf32>
    "tpu.trace_start"() <{level = 10 : i32, message = "bqk,bkd->bqd"}> : () -> ()
    %cst_29 = arith.constant dense<0.000000e+00> : vector<2x6x8xf32>
    %76 = tpu.matmul %74, %75, %cst_29 {dimension_numbers = #tpu.dot_dimension_numbers<[2], [1], [1], [2], [0, 0, 0, 1, 1, 2], [0], [0]>} : vector<2x6x6xf32>, vector<2x6x8xf32>, vector<2x6x8xf32> -> vector<2x6x8xf32>
    "tpu.trace_stop"() : () -> ()
    %77 = tpu.concatenate %28, %44, %60, %76 in 2 : vector<2x6x8xf32>, vector<2x6x8xf32>, vector<2x6x8xf32>, vector<2x6x8xf32> -> vector<2x6x32xf32>
    %78 = vector.shape_cast %77 : vector<2x6x32xf32> to vector<12x32xf32>
    %cst_30 = arith.constant dense<0.000000e+00> : vector<12x32xf32>
    %79 = tpu.matmul %78, %3, %cst_30 {dimension_numbers = #tpu.dot_dimension_numbers<[1], [0], [0], [1], [0, 0, 1, 1], [], []>} : vector<12x32xf32>, vector<32x32xf32>, vector<12x32xf32> -> vector<12x32xf32>
    %80 = vector.broadcast %4 : vector<1x32xf32> to vector<12x32xf32>
    %81 = arith.addf %79, %80 : vector<12x32xf32>
    %82 = vector.shape_cast %81 : vector<12x32xf32> to vector<2x6x32xf32>
    %c0_31 = arith.constant 0 : index
    %c0_32 = arith.constant 0 : index
    %c0_33 = arith.constant 0 : index
    %83 = vector.load %arg6[%c0_31, %c0_32, %c0_33] : memref<2x6x32xf32, #tpu.memory_space<vmem>>, vector<2x6x32xf32>
    tpu.vector_store %arg6[%c0_31, %c0_32, %c0_33], %82 {strides = array<i32>} : memref<2x6x32xf32, #tpu.memory_space<vmem>>, vector<2x6x32xf32>,
    return
  }
  func.func @transform_0(%arg0: i32) -> (i32, i32, i32) {
    %c0_i32 = arith.constant 0 : i32
    %c0_i32_0 = arith.constant 0 : i32
    %c0_i32_1 = arith.constant 0 : i32
    %c0_i32_2 = arith.constant 0 : i32
    return %c0_i32, %c0_i32_0, %c0_i32_1 : i32, i32, i32
  }
  func.func @transform_1(%arg0: i32) -> (i32, i32) {
    %c0_i32 = arith.constant 0 : i32
    %c0_i32_0 = arith.constant 0 : i32
    %c0_i32_1 = arith.constant 0 : i32
    return %c0_i32, %c0_i32_0 : i32, i32
  }
  func.func @transform_2(%arg0: i32) -> (i32, i32) {
    %c0_i32 = arith.constant 0 : i32
    %c0_i32_0 = arith.constant 0 : i32
    %c0_i32_1 = arith.constant 0 : i32
    return %c0_i32, %c0_i32_0 : i32, i32
  }
  func.func @transform_3(%arg0: i32) -> (i32, i32) {
    %c0_i32 = arith.constant 0 : i32
    %c0_i32_0 = arith.constant 0 : i32
    %c0_i32_1 = arith.constant 0 : i32
    return %c0_i32, %c0_i32_0 : i32, i32
  }
  func.func @transform_4(%arg0: i32) -> (i32, i32) {
    %c0_i32 = arith.constant 0 : i32
    %c0_i32_0 = arith.constant 0 : i32
    %c0_i32_1 = arith.constant 0 : i32
    return %c0_i32, %c0_i32_0 : i32, i32
  }
  func.func @transform_5(%arg0: i32) -> (i32, i32, i32) {
    %c0_i32 = arith.constant 0 : i32
    %c0_i32_0 = arith.constant 0 : i32
    %c0_i32_1 = arith.constant 0 : i32
    %c0_i32_2 = arith.constant 0 : i32
    return %c0_i32, %c0_i32_0, %c0_i32_1 : i32, i32, i32
  }
}

</mosaic_0001>

<bundles_post_ra>
// kernel: tpu_custom_call.1
= control target key start
LH: loop header
LB: loop body
LE: loop exit
PB: predicated region body
PF: predicated region fallthrough
CT: control target
= control target key end

     0   :  { %10 = vsyncpa [#allocation3], 0  ;;  %s2108_s18 = smov [#allocation2]   ;;  %s2374_s0 = inlined_call_operand.vmem [shape: f32[2,6,32], index: 0, kind: input, shape index: {}]   ;;  %s2375_s1 = inlined_call_operand.hbm [shape: f32[32,96], index: 1, kind: input, shape index: {}]   ;;  %s2376_s2 = inlined_call_operand.vmem [shape: f32[1,96], index: 2, kind: input, shape index: {}]   ;;  %s2377_s3 = inlined_call_operand.vmem [shape: f32[32,32], index: 3, kind: input, shape index: {}]   ;;  %s2378_s4 = inlined_call_operand.vmem [shape: f32[1,32], index: 4, kind: input, shape index: {}]   ;;  %s2379_s5 = inlined_call_operand.vmem [shape: f32[2,6,32], index: 5, kind: output, shape index: {}]  }
   0x1   :  { %s18_s19 = sshll.u32 %s2108_s18, 4  ;;  %s2084_s22 = scalar_lea.hbm %s2375_s1, 512  ;;  %s19_s19 = int_to_ptr.vmem [resolvable:$true] %s18_s19 }
   0x2   :  { %p2085_p0 = scmp.ne.s32.totalorder %s2375_s1, %s2084_s22  ;;  %p2088_p1 = scmp.lt.u32.totalorder %s2084_s22, %s2375_s1 }
   0x4   :  { %p2090_p2 = pnand %p2088_p1, %p2085_p0 }
   0x6   :  { %2093 = shalt.err (!%p2090_p2)
}
   0x7   :  { %s2094_s27 = scalar_lea.vmem %s19_s19, 512  ;;  %p2099_p4 = scmp.lt.s32.totalorder %s19_s19, %s19_s19 }
   0x8   :  { %p2095_p3 = scmp.ne.s32.totalorder %s19_s19, %s2094_s27  ;;  %p2100_p5 = scmp.lt.s32.totalorder %s2094_s27, %s2094_s27 }
   0xa   :  { %p2101_p6 = por %p2100_p5, %p2099_p4 }
   0xc   :  { %p2102_p7 = pnand %p2101_p6, %p2095_p3 }
   0xe   :  { %2105 = shalt.err (!%p2102_p7)
}
   0xf   :  { %s2109_s28 = smov 128   ;;  %s2110_s29 = smov 8  }
  0x10   :  { %24 = dma.hbm_to_vmem [thread:$0]  %s2375_s1, 512, %s19_s19, [#allocation3], %s2109_s28, %s2109_s28, %s2110_s29  }
  0x11   :  { %2106 = dma.done.wait [#allocation3], 512  }
  0x12   :  { %2107 = vsyncadd [#allocation3], 4294966784  ;;  %v52_v0 = vlaneseq  ;;  %v2111_v1 = vmov 1983009808   ;;  %v36_v6 = vld [vmem:[#allocation2] sm:$0xff]  ;;  %v37_v7 = vld [vmem:[#allocation2 + $0x8] sm:$0xff] }
  0x13   :  { %v50_v2 = vunpack.c.l.s4 %v2111_v1  ;;  %v38_v8 = vld [vmem:[#allocation2 + $0x10] sm:$0xff]  ;;  %v2015_v9 = vpack.c.bf16 %v37_v7, %v36_v6  ;;  %v39_v10 = vld [vmem:[#allocation2 + $0x18] sm:$0xff]  ;;  %v34_v11 = vld [vmem:[%s2374_s0] sm:$0x3f]  ;;  %vm111_vm0 = vcmask 261120   ;;  %v2112_v29 = vmov 0.0  }
  0x14   :  { %v53_v3 = vshrl.u32 %v52_v0, 7  ;;  %v35_v12 = vld [vmem:[%s2374_s0 + $0x8] sm:$0x3f]  ;;  %v2019_v13 = vpack.c.bf16 %v39_v10, %v38_v8  ;;  %v48_v14 = vcombine.high %v34_v11, %v34_v11  ;;  %1924 = vmatprep.subr.mxu1 %v2112_v29  ;;  %v1831_v30 = vld [vmem:[%s2376_s2] ss:$0 sm:$0xff]  ;;  %vm2113_vm1 = vmmov 0  }
  0x15   :  { %v51_v4 = vunpack.c.0.s8 %v50_v2  ;;  %v64_v16 = vcombine.high %v35_v12, %v35_v12  ;;  %2016 = vmatprep.subr.bf16.mxu0 %v2015_v9  ;;  %1926 = vmatprep.mubr.msk.f32.mxu1 %vm2113_vm1, %v2112_v29  ;;  %s2114_s2 = smov 96   ;;  %vm236_vm2 = vcmask 64512   ;;  %vm405_vm3 = vcmask 46080   ;;  %s2115_s11 = smov 64  }
  0x16   :  { %2018 = vmatpush3.bf16.msra.mxu0 %v2015_v9  ;;  %s2116_s12 = smov 88   ;;  %vm434_vm4 = vcmask 1045504   ;;  %s2117_s13 = smov 120   ;;  %vm430_vm5 = vcmask 48128   ;;  %vm1612_vm6 = vcmask 130048   ;;  %vm1615_vm7 = vcmask 195584  }
  0x17   :  { %v2170_v5 = vsub.s32 %v51_v4, %v53_v3  ;;  %2020 = vmatprep.subr.bf16.mxu0 %v2019_v13  ;;  %s2118_s14 = smov 56   ;;  %s2119_s15 = smov 112   ;;  %vm1823_vm8 = vcmask 259072  }
  0x18   :  { %s2120_s16 = smov 80   ;;  %s2121_s17 = smov 48  }
  0x19   :  { %v55_v15 = vrot.slane %v34_v11, %v2170_v5  ;;  %v71_v17 = vrot.slane %v35_v12, %v2170_v5  ;;  %v62_v18 = vrot.slane %v48_v14, %v2170_v5  ;;  %v78_v20 = vrot.slane %v64_v16, %v2170_v5  ;;  %s2122_s18 = smov 72   ;;  %s2123_s19 = smov 104  }
  0x1a   :  { %2022 = vmatpush3.bf16.msra.mxu0 %v2019_v13  ;;  %s2124_s20 = smov 40   ;;  %s2125_s21 = smov 16  }
  0x1b   :  { %v63_v19 = vcombine.high %v55_v15, %v55_v15  ;;  %v79_v21 = vcombine.high %v71_v17, %v71_v17  ;;  %v87_v23 = vcombine.low %v62_v18, %v71_v17  ;;  %1944 = vmatprep.subr.mxu0 %v2112_v29  ;;  %s2126_s22 = smov 24  }
  0x1d   :  { %v86_v22 = vcombine.low %v55_v15, %v63_v19  ;;  %v103_v24 = vcombine.low %v79_v21, %v78_v20  ;;  %v101_v26 = vrot.slane %v87_v23, %v2170_v5 }
  0x1f   :  { %v94_v25 = vrot.slane %v86_v22, %v2170_v5  ;;  %v110_v27 = vrot.slane %v103_v24, %v2170_v5 }
  0x21   :  { %v102_v28 = vcombine.low %v94_v25, %v101_v26 }
  0x23   :  { %1921 = vmatprep.mubr.msk.f32.mxu0 %vm111_vm0, %v102_v28 }
  0x24   :  { %1922 = vmatmul.mubr.msk.f32.vlgmr.msra.gmra.mrb[0].mxu0 %vm111_vm0, %v110_v27 }
  0x25   :  { %1946 = vmatprep.mubr.msk.f32.mxu0 %vm2113_vm1, %v2112_v29 }
  0xf7   :  { %v1923_v31 = vpop.f32.mrb[0].mxu0 }
  0xf8   :  { %v188_v32 = vadd.f32 %v1923_v31, %v1831_v30  ;;  %v182_v33 = vpop.f32.mrb[1].mxu0 }
  0xf9   :  { %v183_v34 = vadd.f32 %v1831_v30, %v182_v33 }
  0xfa   :  { %v216_v35 = vrot.slane %v188_v32, %v2170_v5 }
  0xfb   :  { %v193_v36 = vcombine.high %v183_v34, %v183_v34  ;;  %v200_v37 = vrot.slane %v183_v34, %v2170_v5 }
  0xfc   :  { %v217_v40 = vcombine.high %v216_v35, %v216_v35 }
  0xfd   :  { %v207_v38 = vrot.slane %v193_v36, %v2170_v5  ;;  %v208_v39 = vcombine.high %v200_v37, %v200_v37 }
  0xfe   :  { %v325_v46 = vrot.slane %v217_v40, %v2170_v5 }
  0xff   :  { %v209_v41 = vcombine.high %v207_v38, %v207_v38  ;;  %v218_v42 = vcombine.low %v200_v37, %v208_v39  ;;  %v232_v44 = vrot.slane %v207_v38, %v2170_v5 }
 0x101   :  { %v225_v43 = vrot.slane %v218_v42, %v2170_v5  ;;  %v311_v45 = vcombine.low %v209_v41, %v216_v35 }
 0x103   :  { %v2202_v47 = vcombine.low %v225_v43, %v232_v44  ;;  %v318_v48 = vrot.slane %v311_v45, %v2170_v5 }
 0x105   :  { %v2205_v49 = vcombine.low %v318_v48, %v325_v46  ;;  %234 = vrot.lane.b32.xlu0 %v2202_v47, %s2114_s2 }
 0x109   :  { %327 = vrot.lane.b32.xlu0 %v2205_v49, %s2114_s2 }
 0x177   :  { %v235_v50 = vpop.permute.xlu0 %234 }
 0x178   :  { %1925 = vmatpush3.xpose.msk.msra.mxu1 %vm236_vm2, %v235_v50 }
 0x179   :  { %1929 = vmatprep.subr.mxu1 %v2112_v29 }
 0x17b   :  { %1927 = vmatmul.mubr.msk.f32.vlgmr.msra.gmra.mrb[0].mxu1 %vm236_vm2, %v2202_v47  ;;  %v328_v51 = vpop.permute.xlu0 %327 }
 0x17c   :  { %1930 = vmatpush3.xpose.msk.msra.mxu1 %vm236_vm2, %v328_v51  ;;  %1931 = vmatprep.mubr.msk.f32.mxu1 %vm2113_vm1, %v2112_v29 }
 0x17d   :  { %1934 = vmatprep.subr.mxu1 %v2112_v29 }
 0x17f   :  { %1932 = vmatmul.mubr.msk.f32.vlgmr.msra.gmra.mrb[2].mxu1 %vm236_vm2, %v2205_v49 }
 0x180   :  { %1936 = vmatprep.mubr.msk.f32.mxu1 %vm2113_vm1, %v2112_v29 }
 0x24e   :  { %v307_v52 = vpop.f32.mrb[0].mxu1 }
 0x24f   :  { %v403_v53 = vmul.f32 0.35355338, %v307_v52  ;;  %v1928_v54 = vpop.f32.mrb[1].mxu1 }
 0x251   :  { %v406_v55 = vsel %vm405_vm3, %v403_v53, -inf }
 0x252   :  { %407 = vmax.xlane.f32.xlu1 %v406_v55  ;;  %v399_v56 = vpop.f32.mrb[2].mxu1 }
 0x253   :  { %v404_v57 = vmul.f32 0.35355338, %v399_v56  ;;  %v1933_v58 = vpop.f32.mrb[3].mxu1 }
 0x255   :  { %v409_v59 = vsel %vm405_vm3, %v404_v57, -inf }
 0x256   :  { %410 = vmax.xlane.f32.xlu1 %v409_v59 }
 0x267   :  { %428 = vrot.lane.b32.xlu1 %v2202_v47, %s2115_s11 }
 0x26b   :  { %507 = vrot.lane.b32.xlu1 %v2205_v49, %s2115_s11 }
 0x26f   :  { %586 = vrot.lane.b32.xlu1 %v2202_v47, %s2116_s12 }
 0x273   :  { %664 = vrot.lane.b32.xlu1 %v2205_v49, %s2116_s12 }
 0x2df   :  { %v408_v60 = vpop.xlane.xlu1 %407 }
 0x2e0   :  { %v412_v61 = vsub.f32 %v403_v53, %v408_v60 }
 0x2e2   :  { %v414_v62 = vmul.f32 1.442695, %v412_v61 }
 0x2e3   :  { %v411_v63 = vpop.xlane.xlu1 %410 }
 0x2e4   :  { %2052 = vpow2.f32 %v414_v62  ;;  %v413_v0 = vsub.f32 %v404_v57, %v411_v63 }
 0x2e6   :  { %v416_v1 = vmul.f32 1.442695, %v413_v0 }
 0x2e7   :  { %v429_v2 = vpop.permute.xlu1 %428 }
 0x2e8   :  { %2054 = vpow2.f32 %v416_v1  ;;  %1935 = vmatpush3.msk.msra.mxu1 %vm434_vm4, %v429_v2 }
 0x2e9   :  { %1939 = vmatprep.subr.mxu1 %v2112_v29 }
 0x2eb   :  { %v508_v3 = vpop.permute.xlu1 %507 }
 0x2ee   :  { %v2053_v4 = vpop.eup %2052 }
 0x2ef   :  { %v587_v6 = vpop.permute.xlu1 %586  ;;  %v418_v7 = vsel %vm405_vm3, %v2053_v4, 0.0 }
 0x2f0   :  { %419 = vadd.xlane.f32.xlu0 %v418_v7  ;;  %1945 = vmatpush3.xpose.msk.msra.mxu0 %vm236_vm2, %v587_v6 }
 0x2f1   :  { %1954 = vmatprep.subr.mxu0 %v2112_v29 }
 0x2f2   :  { %v2055_v8 = vpop.eup %2054 }
 0x2f3   :  { %v421_v9 = vsel %vm405_vm3, %v2055_v8, 0.0  ;;  %v665_v10 = vpop.permute.xlu1 %664 }
 0x2f4   :  { %422 = vadd.xlane.f32.xlu1 %v421_v9 }
 0x305   :  { %662 = vrot.lane.b32.xlu1 %v2205_v49, %s2117_s13 }
 0x306   :  { %584 = vrot.lane.b32.xlu0 %v2202_v47, %s2117_s13 }
 0x37d   :  { %v420_v11 = vpop.xlane.xlu0 %419 }
 0x37e   :  { %2056 = vrcp.f32 %v420_v11 }
 0x381   :  { %v423_v12 = vpop.xlane.xlu1 %422  ;;  %v585_v13 = vpop.permute.xlu0 %584 }
 0x382   :  { %2058 = vrcp.f32 %v423_v12  ;;  %1947 = vmatmul.mubr.msk.f32.vlgmr.msra.gmra.mrb[2].mxu0 %vm236_vm2, %v585_v13 }
 0x383   :  { %1956 = vmatprep.mubr.msk.f32.mxu0 %vm2113_vm1, %v2112_v29 }
 0x385   :  { %v663_v18 = vpop.permute.xlu1 %662 }
 0x388   :  { %v2057_v14 = vpop.eup %2056 }
 0x389   :  { %v425_v15 = vmul.f32 %v2057_v14, %v2053_v4 }
 0x38b   :  { %1937 = vmatmul.mubr.msk.f32.vlgmr.msra.gmra.mrb[4].mxu1 %vm430_vm5, %v425_v15 }
 0x38c   :  { %v2059_v16 = vpop.eup %2058  ;;  %1940 = vmatpush3.msk.msra.mxu1 %vm434_vm4, %v508_v3  ;;  %1941 = vmatprep.mubr.msk.f32.mxu1 %vm2113_vm1, %v2112_v29 }
 0x38d   :  { %v427_v17 = vmul.f32 %v2059_v16, %v2055_v8  ;;  %1949 = vmatprep.subr.mxu1 %v2112_v29 }
 0x38f   :  { %1942 = vmatmul.mubr.msk.f32.vlgmr.msra.gmra.mrb[6].mxu1 %vm430_vm5, %v427_v17 }
 0x390   :  { %1951 = vmatprep.mubr.msk.f32.mxu1 %vm2113_vm1, %v2112_v29 }
 0x393   :  { %1950 = vmatpush3.xpose.msk.msra.mxu1 %vm236_vm2, %v665_v10 }
 0x394   :  { %1959 = vmatprep.subr.mxu1 %v2112_v29 }
 0x396   :  { %1952 = vmatmul.mubr.msk.f32.vlgmr.msra.gmra.mrb[8].mxu1 %vm236_vm2, %v663_v18 }
 0x397   :  { %1961 = vmatprep.mubr.msk.f32.mxu1 %vm2113_vm1, %v2112_v29 }
 0x455   :  { %v658_v19 = vpop.f32.mrb[2].mxu0 }
 0x456   :  { %v740_v20 = vmul.f32 0.35355338, %v658_v19  ;;  %v1948_v21 = vpop.f32.mrb[3].mxu0 }
 0x458   :  { %v742_v22 = vsel %vm405_vm3, %v740_v20, -inf }
 0x459   :  { %743 = vmax.xlane.f32.xlu1 %v742_v22 }
 0x45e   :  { %v2252_v23 = vpop.f32.mrb[4].mxu1 }
 0x45f   :  { %v1938_v24 = vpop.f32.mrb[5].mxu1 }
 0x462   :  { %v2254_v25 = vpop.f32.mrb[6].mxu1 }
 0x463   :  { %v1943_v26 = vpop.f32.mrb[7].mxu1 }
 0x469   :  { %v736_v27 = vpop.f32.mrb[8].mxu1 }
 0x46a   :  { %v741_v28 = vmul.f32 0.35355338, %v736_v27  ;;  %v1953_v30 = vpop.f32.mrb[9].mxu1 }
 0x46c   :  { %v745_v31 = vsel %vm405_vm3, %v741_v28, -inf }
 0x46d   :  { %746 = vmax.xlane.f32.xlu0 %v745_v31 }
 0x483   :  { %841 = vrot.lane.b32.xlu0 %v2205_v49, %s2118_s14 }
 0x487   :  { %918 = vrot.lane.b32.xlu0 %v2202_v47, %s2119_s15 }
 0x4e6   :  { %v744_v32 = vpop.xlane.xlu1 %743 }
 0x4e7   :  { %v748_v33 = vsub.f32 %v740_v20, %v744_v32 }
 0x4e9   :  { %v750_v34 = vmul.f32 1.442695, %v748_v33 }
 0x4eb   :  { %2060 = vpow2.f32 %v750_v34 }
 0x4f5   :  { %v2061_v35 = vpop.eup %2060 }
 0x4f6   :  { %v754_v36 = vsel %vm405_vm3, %v2061_v35, 0.0 }
 0x4f7   :  { %755 = vadd.xlane.f32.xlu1 %v754_v36 }
 0x4fa   :  { %v747_v37 = vpop.xlane.xlu0 %746 }
 0x4fb   :  { %v749_v39 = vsub.f32 %v741_v28, %v747_v37 }
 0x4fd   :  { %v752_v40 = vmul.f32 1.442695, %v749_v39 }
 0x4fe   :  { %v842_v38 = vpop.permute.xlu0 %841 }
 0x4ff   :  { %1960 = vmatpush3.msk.msra.mxu1 %vm434_vm4, %v842_v38  ;;  %2062 = vpow2.f32 %v752_v40 }
 0x500   :  { %1969 = vmatprep.subr.mxu1 %v2112_v29 }
 0x502   :  { %v919_v50 = vpop.permute.xlu0 %918 }
 0x508   :  { %764 = vrot.lane.b32.xlu1 %v2202_v47, %s2118_s14 }
 0x509   :  { %v2063_v41 = vpop.eup %2062 }
 0x50a   :  { %v757_v42 = vsel %vm405_vm3, %v2063_v41, 0.0 }
 0x50c   :  { %920 = vrot.lane.b32.xlu1 %v2202_v47, %s2120_s16 }
 0x510   :  { %998 = vrot.lane.b32.xlu1 %v2205_v49, %s2120_s16 }
 0x534   :  { %758 = vadd.xlane.f32.xlu1 %v757_v42 }
 0x545   :  { %996 = vrot.lane.b32.xlu1 %v2205_v49, %s2119_s15 }
 0x584   :  { %v756_v43 = vpop.xlane.xlu1 %755 }
 0x585   :  { %2064 = vrcp.f32 %v756_v43 }
 0x588   :  { %v765_v44 = vpop.permute.xlu1 %764 }
 0x589   :  { %1955 = vmatpush3.msk.msra.mxu0 %vm434_vm4, %v765_v44 }
 0x58a   :  { %1964 = vmatprep.subr.mxu0 %v2112_v29 }
 0x58c   :  { %v921_v48 = vpop.permute.xlu1 %920 }
 0x58f   :  { %v2065_v45 = vpop.eup %2064 }
 0x590   :  { %v761_v46 = vmul.f32 %v2065_v45, %v2061_v35  ;;  %v999_v51 = vpop.permute.xlu1 %998 }
 0x592   :  { %1957 = vmatmul.mubr.msk.f32.vlgmr.msra.gmra.mrb[4].mxu0 %vm430_vm5, %v761_v46 }
 0x593   :  { %1965 = vmatpush3.xpose.msk.msra.mxu0 %vm236_vm2, %v921_v48  ;;  %1966 = vmatprep.mubr.msk.f32.mxu0 %vm2113_vm1, %v2112_v29 }
 0x594   :  { %1974 = vmatprep.subr.mxu0 %v2112_v29 }
 0x596   :  { %1967 = vmatmul.mubr.msk.f32.vlgmr.msra.gmra.mrb[6].mxu0 %vm236_vm2, %v919_v50 }
 0x597   :  { %1976 = vmatprep.mubr.msk.f32.mxu0 %vm2113_vm1, %v2112_v29 }
 0x5c1   :  { %v759_v52 = vpop.xlane.xlu1 %758 }
 0x5c2   :  { %2066 = vrcp.f32 %v759_v52 }
 0x5c5   :  { %v997_v55 = vpop.permute.xlu1 %996 }
 0x5cc   :  { %v2067_v53 = vpop.eup %2066 }
 0x5cd   :  { %v763_v54 = vmul.f32 %v2067_v53, %v2063_v41 }
 0x5cf   :  { %1962 = vmatmul.mubr.msk.f32.vlgmr.msra.gmra.mrb[10].mxu1 %vm430_vm5, %v763_v54 }
 0x5d0   :  { %1970 = vmatpush3.xpose.msk.msra.mxu1 %vm236_vm2, %v999_v51  ;;  %1971 = vmatprep.mubr.msk.f32.mxu1 %vm2113_vm1, %v2112_v29 }
 0x5d1   :  { %1979 = vmatprep.subr.mxu1 %v2112_v29 }
 0x5d3   :  { %1972 = vmatmul.mubr.msk.f32.vlgmr.msra.gmra.mrb[12].mxu1 %vm236_vm2, %v997_v55 }
 0x5d4   :  { %1981 = vmatprep.mubr.msk.f32.mxu1 %vm2113_vm1, %v2112_v29 }
 0x665   :  { %v2285_v56 = vpop.f32.mrb[4].mxu0 }
 0x666   :  { %v1958_v57 = vpop.f32.mrb[5].mxu0 }
 0x669   :  { %v992_v58 = vpop.f32.mrb[6].mxu0 }
 0x66a   :  { %v1074_v59 = vmul.f32 0.35355338, %v992_v58  ;;  %v1968_v60 = vpop.f32.mrb[7].mxu0 }
 0x66c   :  { %v1076_v61 = vsel %vm405_vm3, %v1074_v59, -inf }
 0x66d   :  { %1077 = vmax.xlane.f32.xlu0 %v1076_v61  ;;  %v41_v61 = vld [vmem:[%s2377_s3] sm:$0xff] }
 0x6a2   :  { %v2288_v62 = vpop.f32.mrb[10].mxu1 }
 0x6a3   :  { %v1963_v63 = vpop.f32.mrb[11].mxu1 }
 0x6a6   :  { %v1070_v0 = vpop.f32.mrb[12].mxu1 }
 0x6a7   :  { %v1075_v1 = vmul.f32 0.35355338, %v1070_v0  ;;  %v1973_v2 = vpop.f32.mrb[13].mxu1  ;;  %v43_v0 = vld [vmem:[%s2377_s3 + $0x10] sm:$0xff] }
 0x6a9   :  { %v1079_v3 = vsel %vm405_vm3, %v1075_v1, -inf }
 0x6aa   :  { %1080 = vmax.xlane.f32.xlu1 %v1079_v3 }
 0x6bb   :  { %1098 = vrot.lane.b32.xlu1 %v2202_v47, %s2121_s17 }
 0x6bf   :  { %1254 = vrot.lane.b32.xlu1 %v2202_v47, %s2122_s18 }
 0x6c3   :  { %1332 = vrot.lane.b32.xlu1 %v2205_v49, %s2122_s18 }
 0x6c7   :  { %1330 = vrot.lane.b32.xlu1 %v2205_v49, %s2123_s19 }
 0x6fa   :  { %v1078_v4 = vpop.xlane.xlu0 %1077 }
 0x6fb   :  { %v1082_v6 = vsub.f32 %v1074_v59, %v1078_v4 }
 0x6fd   :  { %v1084_v7 = vmul.f32 1.442695, %v1082_v6 }
 0x6ff   :  { %2068 = vpow2.f32 %v1084_v7 }
 0x709   :  { %v2069_v8 = vpop.eup %2068 }
 0x70a   :  { %v1088_v9 = vsel %vm405_vm3, %v2069_v8, 0.0 }
 0x70b   :  { %1089 = vadd.xlane.f32.xlu0 %v1088_v9 }
 0x721   :  { %1175 = vrot.lane.b32.xlu0 %v2205_v49, %s2121_s17 }
 0x737   :  { %v1081_v10 = vpop.xlane.xlu1 %1080 }
 0x738   :  { %v1083_v11 = vsub.f32 %v1075_v1, %v1081_v10  ;;  %v44_v1 = vld [vmem:[%s2377_s3 + $0x18] sm:$0xff] }
 0x739   :  { %v2027_v2 = vpack.c.bf16 %v44_v1, %v43_v0 }
 0x73a   :  { %v1086_v12 = vmul.f32 1.442695, %v1083_v11 }
 0x73b   :  { %v1099_v13 = vpop.permute.xlu1 %1098 }
 0x73c   :  { %2070 = vpow2.f32 %v1086_v12  ;;  %1975 = vmatpush3.msk.msra.mxu0 %vm434_vm4, %v1099_v13 }
 0x73d   :  { %1984 = vmatprep.subr.mxu0 %v2112_v29 }
 0x73f   :  { %v1255_v20 = vpop.permute.xlu1 %1254 }
 0x743   :  { %v1333_v26 = vpop.permute.xlu1 %1332 }
 0x746   :  { %v2071_v14 = vpop.eup %2070 }
 0x747   :  { %v1091_v15 = vsel %vm405_vm3, %v2071_v14, 0.0  ;;  %v1331_v28 = vpop.permute.xlu1 %1330 }
 0x748   :  { %1092 = vadd.xlane.f32.xlu0 %v1091_v15 }
 0x75e   :  { %1252 = vrot.lane.b32.xlu0 %v2202_v47, %s2123_s19 }
 0x798   :  { %v1090_v16 = vpop.xlane.xlu0 %1089 }
 0x799   :  { %2072 = vrcp.f32 %v1090_v16 }
 0x79c   :  { %v1176_v17 = vpop.permute.xlu0 %1175 }
 0x79d   :  { %1980 = vmatpush3.msk.msra.mxu1 %vm434_vm4, %v1176_v17 }
 0x79e   :  { %1989 = vmatprep.subr.mxu1 %v2112_v29 }
 0x7a3   :  { %v2073_v18 = vpop.eup %2072 }
 0x7a4   :  { %v1095_v19 = vmul.f32 %v2073_v18, %v2069_v8 }
 0x7a6   :  { %1977 = vmatmul.mubr.msk.f32.vlgmr.msra.gmra.mrb[8].mxu0 %vm430_vm5, %v1095_v19 }
 0x7a7   :  { %1985 = vmatpush3.xpose.msk.msra.mxu0 %vm236_vm2, %v1255_v20  ;;  %1986 = vmatprep.mubr.msk.f32.mxu0 %vm2113_vm1, %v2112_v29 }
 0x7a8   :  { %1994 = vmatprep.subr.mxu0 %v2112_v29 }
 0x7d5   :  { %v1093_v21 = vpop.xlane.xlu0 %1092 }
 0x7d6   :  { %2074 = vrcp.f32 %v1093_v21 }
 0x7d9   :  { %v1253_v22 = vpop.permute.xlu0 %1252 }
 0x7da   :  { %1987 = vmatmul.mubr.msk.f32.vlgmr.msra.gmra.mrb[10].mxu0 %vm236_vm2, %v1253_v22 }
 0x7db   :  { %1996 = vmatprep.mubr.msk.f32.mxu0 %vm2113_vm1, %v2112_v29 }
 0x7e0   :  { %v2075_v24 = vpop.eup %2074 }
 0x7e1   :  { %v1097_v27 = vmul.f32 %v2075_v24, %v2071_v14 }
 0x7e3   :  { %1982 = vmatmul.mubr.msk.f32.vlgmr.msra.gmra.mrb[14].mxu1 %vm430_vm5, %v1097_v27 }
 0x7e4   :  { %1990 = vmatpush3.xpose.msk.msra.mxu1 %vm236_vm2, %v1333_v26  ;;  %1991 = vmatprep.mubr.msk.f32.mxu1 %vm2113_vm1, %v2112_v29 }
 0x7e5   :  { %1999 = vmatprep.subr.mxu1 %v2112_v29 }
 0x7e7   :  { %1992 = vmatmul.mubr.msk.f32.vlgmr.msra.gmra.mrb[16].mxu1 %vm236_vm2, %v1331_v28 }
 0x7e8   :  { %2001 = vmatprep.mubr.msk.f32.mxu1 %vm2113_vm1, %v2112_v29 }
 0x879   :  { %v1171_v30 = vpop.f32.mrb[8].mxu0 }
 0x87a   :  { %v1978_v31 = vpop.f32.mrb[9].mxu0 }
 0x8ad   :  { %v1326_v32 = vpop.f32.mrb[10].mxu0 }
 0x8ae   :  { %v1408_v33 = vmul.f32 0.35355338, %v1326_v32  ;;  %v1988_v34 = vpop.f32.mrb[11].mxu0 }
 0x8af   :  { %v1866_v34 = vld [vmem:[%s2378_s4] ss:$0 sm:$0xff] }
 0x8b0   :  { %v1410_v35 = vsel %vm405_vm3, %v1408_v33, -inf }
 0x8b1   :  { %1411 = vmax.xlane.f32.xlu0 %v1410_v35 }
 0x8b6   :  { %v1248_v36 = vpop.f32.mrb[14].mxu1 }
 0x8b7   :  { %v1983_v37 = vpop.f32.mrb[15].mxu1 }
 0x8ba   :  { %v1404_v38 = vpop.f32.mrb[16].mxu1 }
 0x8bb   :  { %v1409_v39 = vmul.f32 0.35355338, %v1404_v38  ;;  %v1993_v40 = vpop.f32.mrb[17].mxu1 }
 0x8bd   :  { %v1413_v41 = vsel %vm405_vm3, %v1409_v39, -inf }
 0x8be   :  { %1414 = vmax.xlane.f32.xlu1 %v1413_v41 }
 0x8cf   :  { %1432 = vrot.lane.b32.xlu1 %v2202_v47, %s2124_s20 }
 0x8d3   :  { %1588 = vrot.lane.b32.xlu1 %v2285_v56, %s2110_s29 }
 0x8d7   :  { %1596 = vrot.lane.b32.xlu1 %v1171_v30, %s2125_s21 }
 0x93e   :  { %v1412_v29 = vpop.xlane.xlu0 %1411 }
 0x93f   :  { %v1416_v42 = vsub.f32 %v1408_v33, %v1412_v29 }
 0x941   :  { %v1418_v43 = vmul.f32 1.442695, %v1416_v42 }
 0x943   :  { %2076 = vpow2.f32 %v1418_v43 }
 0x94b   :  { %v1415_v44 = vpop.xlane.xlu1 %1414 }
 0x94c   :  { %v1417_v45 = vsub.f32 %v1409_v39, %v1415_v44 }
 0x94d   :  { %v2077_v46 = vpop.eup %2076 }
 0x94e   :  { %v1420_v48 = vmul.f32 1.442695, %v1417_v45  ;;  %v1422_v50 = vsel %vm405_vm3, %v2077_v46, 0.0 }
 0x94f   :  { %v1433_v51 = vpop.permute.xlu1 %1432  ;;  %1423 = vadd.xlane.f32.xlu0 %v1422_v50 }
 0x950   :  { %2078 = vpow2.f32 %v1420_v48  ;;  %1995 = vmatpush3.msk.msra.mxu0 %vm434_vm4, %v1433_v51 }
 0x953   :  { %v1589_v6 = vpop.permute.xlu1 %1588 }
 0x954   :  { %v1610_v9 = vsel %vm236_vm2, %v2252_v23, %v1589_v6 }
 0x957   :  { %v1597_v7 = vpop.permute.xlu1 %1596 }
 0x958   :  { %v1613_v10 = vsel %vm1612_vm6, %v1610_v9, %v1597_v7 }
 0x95a   :  { %v2079_v47 = vpop.eup %2078 }
 0x95b   :  { %v1425_v52 = vsel %vm405_vm3, %v2079_v47, 0.0 }
 0x95c   :  { %1426 = vadd.xlane.f32.xlu0 %v1425_v52 }
 0x972   :  { %1509 = vrot.lane.b32.xlu0 %v2205_v49, %s2124_s20 }
 0x976   :  { %1590 = vrot.lane.b32.xlu0 %v2288_v62, %s2110_s29  ;;  %v42_v62 = vld [vmem:[%s2377_s3 + $0x8] sm:$0xff] }
 0x977   :  { %v2023_v63 = vpack.c.bf16 %v42_v62, %v41_v61 }
 0x979   :  { %2024 = vmatprep.subr.bf16.mxu0 %v2023_v63 }
 0x97a   :  { %1598 = vrot.lane.b32.xlu0 %v1248_v36, %s2125_s21 }
 0x9dc   :  { %v1424_v53 = vpop.xlane.xlu0 %1423 }
 0x9dd   :  { %2080 = vrcp.f32 %v1424_v53 }
 0x9e7   :  { %v2081_v54 = vpop.eup %2080 }
 0x9e8   :  { %v1429_v55 = vmul.f32 %v2081_v54, %v2077_v46 }
 0x9e9   :  { %v1427_v56 = vpop.xlane.xlu0 %1426 }
 0x9ea   :  { %2082 = vrcp.f32 %v1427_v56  ;;  %1997 = vmatmul.mubr.msk.f32.vlgmr.msra.gmra.mrb[12].mxu0 %vm430_vm5, %v1429_v55 }
 0x9eb   :  { %2026 = vmatpush3.bf16.msra.mxu0 %v2023_v63 }
 0x9ec   :  { %2028 = vmatprep.subr.bf16.mxu0 %v2027_v2 }
 0x9ed   :  { %v1510_v57 = vpop.permute.xlu0 %1509 }
 0x9ee   :  { %2000 = vmatpush3.msk.msra.mxu1 %vm434_vm4, %v1510_v57 }
 0x9ef   :  { %2030 = vmatpush3.bf16.msra.mxu0 %v2027_v2 }
 0x9f1   :  { %v1591_v11 = vpop.permute.xlu0 %1590 }
 0x9f2   :  { %v1611_v17 = vsel %vm236_vm2, %v2254_v25, %v1591_v11 }
 0x9f4   :  { %v2083_v58 = vpop.eup %2082 }
 0x9f5   :  { %v1431_v59 = vmul.f32 %v2083_v58, %v2079_v47  ;;  %v1599_v14 = vpop.permute.xlu0 %1598 }
 0x9f6   :  { %v1614_v18 = vsel %vm1612_vm6, %v1611_v17, %v1599_v14 }
 0x9f7   :  { %2002 = vmatmul.mubr.msk.f32.vlgmr.msra.gmra.mrb[18].mxu1 %vm430_vm5, %v1431_v59 }
 0xabd   :  { %v1505_v49 = vpop.f32.mrb[12].mxu0 }
 0xabe   :  { %1604 = vrot.lane.b32.xlu1 %v1505_v49, %s2126_s22  ;;  %v1998_v60 = vpop.f32.mrb[13].mxu0 }
 0xaca   :  { %v1582_v3 = vpop.f32.mrb[18].mxu1 }
 0xacb   :  { %v2003_v4 = vpop.f32.mrb[19].mxu1  ;;  %1606 = vrot.lane.b32.xlu1 %v1582_v3, %s2126_s22 }
 0xb30   :  { %v1605_v8 = vpop.permute.xlu1 %1604 }
 0xb31   :  { %v1616_v12 = vsel %vm1615_vm7, %v1613_v10, %v1605_v8 }
 0xb32   :  { %v1627_v13 = vrot.slane %v1616_v12, %v2170_v5  ;;  %v1620_v15 = vcombine.high %v1616_v12, %v1616_v12 }
 0xb34   :  { %v1635_v16 = vcombine.high %v1627_v13, %v1627_v13  ;;  %v1634_v21 = vrot.slane %v1620_v15, %v2170_v5 }
 0xb36   :  { %v1658_v22 = vcombine.low %v1627_v13, %v1635_v16 }
 0xb38   :  { %v1666_v30 = vrot.slane %v1658_v22, %v2170_v5 }
 0xb3d   :  { %v1607_v19 = vpop.permute.xlu1 %1606 }
 0xb3e   :  { %v1617_v20 = vsel %vm1615_vm7, %v1614_v18, %v1607_v19 }
 0xb3f   :  { %v1636_v24 = vcombine.high %v1617_v20, %v1617_v20  ;;  %v1643_v23 = vrot.slane %v1617_v20, %v2170_v5 }
 0xb41   :  { %v1650_v26 = vrot.slane %v1636_v24, %v2170_v5  ;;  %v1651_v27 = vcombine.high %v1643_v23, %v1643_v23  ;;  %v1659_v28 = vcombine.low %v1634_v21, %v1643_v23 }
 0xb43   :  { %v1673_v31 = vrot.slane %v1659_v28, %v2170_v5  ;;  %v1675_v32 = vcombine.low %v1651_v27, %v1650_v26 }
 0xb45   :  { %v1682_v25 = vrot.slane %v1675_v32, %v2170_v5  ;;  %v1674_v33 = vcombine.low %v1666_v30, %v1673_v31 }
 0xb47   :  { %2012 = vmatprep.mubr.msk.f32.mxu0 %vm111_vm0, %v1674_v33 }
 0xb48   :  { %2013 = vmatmul.mubr.msk.f32.vlgmr.msra.gmra.mrb[14].mxu0 %vm111_vm0, %v1682_v25 }
 0xc1b   :  { %v2014_v35 = vpop.f32.mrb[14].mxu0 }
 0xc1c   :  { %v1759_v36 = vadd.f32 %v2014_v35, %v1866_v34  ;;  %v1753_v37 = vpop.f32.mrb[15].mxu0 }
 0xc1d   :  { %v1754_v38 = vadd.f32 %v1866_v34, %v1753_v37 }
 0xc1e   :  { %v1787_v39 = vrot.slane %v1759_v36, %v2170_v5 }
 0xc1f   :  { %v1764_v40 = vcombine.high %v1754_v38, %v1754_v38  ;;  %v1771_v41 = vrot.slane %v1754_v38, %v2170_v5 }
 0xc20   :  { %v1788_v43 = vcombine.high %v1787_v39, %v1787_v39 }
 0xc21   :  { %v1778_v29 = vrot.slane %v1764_v40, %v2170_v5  ;;  %v1779_v42 = vcombine.high %v1771_v41, %v1771_v41 }
 0xc22   :  { %v1819_v51 = vrot.slane %v1788_v43, %v2170_v5 }
 0xc23   :  { %v1780_v44 = vcombine.high %v1778_v29, %v1778_v29  ;;  %v1789_v45 = vcombine.low %v1771_v41, %v1779_v42  ;;  %v1803_v48 = vrot.slane %v1778_v29, %v2170_v5 }
 0xc25   :  { %v1796_v46 = vrot.slane %v1789_v45, %v2170_v5  ;;  %v1805_v50 = vcombine.low %v1780_v44, %v1787_v39 }
 0xc27   :  { %v1804_v47 = vcombine.low %v1796_v46, %v1803_v48  ;;  %v1812_v52 = vrot.slane %v1805_v50, %v2170_v5 }
 0xc29   :  { %v1820_v53 = vcombine.low %v1812_v52, %v1819_v51  ;;  %1824 = vst.msk [vmem:[%s2379_s5] sm:$0x3f] %vm1823_vm8, %v1804_v47 }
 0xc2b   :  { %1825 = vst.msk [vmem:[%s2379_s5 + $0x8] sm:$0x3f] %vm1823_vm8, %v1820_v53 }
 0xc2c   :  { %1830 = vsyncpa [#allocation3], 1 }

</bundles_post_ra>
